<compile_context>
chip_gen: v6e
topology: v6e:2x2x1
jax: 0.10.0
libtpu: 0.0.40
codegen_flags: <defaults>
</compile_context>

<pallas_src>
import jax
import jax.numpy as jnp
from jax.experimental import pallas as pl
from jax.experimental.pallas import tpu as pltpu

_LANE = 128
_SUBLANE = 8


def _round_up(n, m):
    return (n + m - 1) // m * m


def _pad2d(a, rows, cols):
    r, c = a.shape
    if r == rows and c == cols:
        return a
    # Zero padding is what keeps the math exact: padded hidden lanes carry sigmoid(0)=0.5,
    # which only contributes nothing because the corresponding (padded) weight ROWS of the
    # next layer are zero. Do not change this to any non-zero fill.
    return jnp.pad(a, ((0, rows - r), (0, cols - c)))


def _vmem_limit_bytes():
    # ~80% of physical VMEM per TensorCore: ~51 MiB on v7x (64 MiB), ~102 MiB on v5e/v6e
    # (128 MiB). Falls back to a conservative 48 MiB if the query is unavailable.
    try:
        info = pltpu.get_tpu_info()
        cap = getattr(info, "vmem_capacity_bytes", None)
        if cap:
            return int(0.8 * cap)
    except Exception:
        pass
    return 48 * 1024 * 1024


def _sigmoid_eup(h):
    # 1 / (1 + exp(-h)): exp on the EUP, reciprocal on the EUP (approx) -> frees VALU slots.
    return pl.reciprocal(1.0 + jnp.exp(-h), approx=True)


def _mlp_kernel(x_ref, w1_ref, b1_ref, w2_ref, b2_ref, w3_ref, b3_ref, o_ref):
    # x is already bf16 (cast fused with the wrapper-side pad); f32 accumulation on the MXU,
    # bias-add / sigmoid in f32.
    x = x_ref[...]

    h1 = jnp.dot(x, w1_ref[...], preferred_element_type=jnp.float32) + b1_ref[...]
    h1 = _sigmoid_eup(h1)

    h2 = jnp.dot(h1.astype(jnp.bfloat16), w2_ref[...],
                 preferred_element_type=jnp.float32) + b2_ref[...]
    h2 = _sigmoid_eup(h2)

    out = jnp.dot(h2.astype(jnp.bfloat16), w3_ref[...],
                  preferred_element_type=jnp.float32) + b3_ref[...]
    o_ref[...] = out.astype(o_ref.dtype)


def fine_tuning_mlp_forward(x, params, *, batch_tile=512):
    """x: any shape (B, ...) — flattened to (B, input_dim) like nn.Flatten."""
    w1, b1, w2, b2, w3, b3 = params
    batch = x.shape[0]
    x2d = x.reshape(batch, -1)

    input_dim, hidden_dim = w1.shape
    output_dim = w3.shape[1]
    assert x2d.shape[1] == input_dim

    # Lane padding (zero padding preserves the math exactly — see _pad2d comment).
    in_pad = _round_up(input_dim, _LANE)
    hid_pad = _round_up(hidden_dim, _LANE)
    out_pad = _round_up(output_dim, _LANE)

    # Batch tiling: tb >= 8 (sublane-aligned). Large batches use `batch_tile` rows per step;
    # mid-size batches are split into >= 2 steps so both v7x TensorCores get work.
    if batch >= batch_tile:
        tb = _round_up(batch_tile, _SUBLANE)
    elif batch >= 2 * _SUBLANE:
        tb = _round_up(pl.cdiv(batch, 2), _SUBLANE)
    else:
        tb = _round_up(max(batch, 1), _SUBLANE)
    b_pad = _round_up(batch, tb)
    num_tiles = b_pad // tb

    # Pad + cast activations once on the wrapper side (the pad already makes a full HBM pass,
    # so the bf16 convert is free here and halves the x stream into the kernel).
    x_p = _pad2d(x2d, b_pad, in_pad).astype(jnp.bfloat16)
    w1_p = _pad2d(w1, in_pad, hid_pad).astype(jnp.bfloat16)
    w2_p = _pad2d(w2, hid_pad, hid_pad).astype(jnp.bfloat16)
    w3_p = _pad2d(w3, hid_pad, out_pad).astype(jnp.bfloat16)
    b1_p = _pad2d(b1.reshape(1, -1), 1, hid_pad).astype(jnp.float32)
    b2_p = _pad2d(b2.reshape(1, -1), 1, hid_pad).astype(jnp.float32)
    b3_p = _pad2d(b3.reshape(1, -1), 1, out_pad).astype(jnp.float32)

    # x/out blocks walk the batch grid axis; weights/biases are VMEM-resident (block (0,0)
    # every step) and single-buffered — constant index_map means they are DMA'd exactly once,
    # so a second buffer would be wasted VMEM.
    x_kwargs = {}
    if num_tiles >= 3:
        # Deeper buffering hides the x DMA once weights are resident; cheap at these tile sizes.
        x_kwargs["pipeline_mode"] = pl.Buffered(3)
    x_spec = pl.BlockSpec((tb, in_pad), lambda i: (i, 0), **x_kwargs)
    resident = lambda shape: pl.BlockSpec(shape, lambda i: (0, 0),
                                          pipeline_mode=pl.Buffered(1))

    out_padded = pl.pallas_call(
        _mlp_kernel,
        out_shape=jax.ShapeDtypeStruct((b_pad, out_pad), jnp.float32),
        grid_spec=pltpu.PrefetchScalarGridSpec(
            num_scalar_prefetch=0,
            grid=(num_tiles,),
            in_specs=[
                x_spec,
                resident((in_pad, hid_pad)),
                resident((1, hid_pad)),
                resident((hid_pad, hid_pad)),
                resident((1, hid_pad)),
                resident((hid_pad, out_pad)),
                resident((1, out_pad)),
            ],
            out_specs=pl.BlockSpec((tb, out_pad), lambda i: (i, 0)),
        ),
        compiler_params=pltpu.CompilerParams(
            dimension_semantics=("parallel",),
            vmem_limit_bytes=_vmem_limit_bytes(),
        ),
    )(x_p, w1_p, b1_p, w2_p, b2_p, w3_p, b3_p)

    return out_padded[:batch, :output_dim]


def init_params(key, input_dim, hidden_dim, output_dim):
    """Matches nn.init.normal_(std=0.05) weights, zero biases.

    PyTorch Linear weight is (out, in); we store the transpose (in, out)."""
    k1, k2, k3 = jax.random.split(key, 3)
    w1 = 0.05 * jax.random.normal(k1, (input_dim, hidden_dim), dtype=jnp.float32)
    w2 = 0.05 * jax.random.normal(k2, (hidden_dim, hidden_dim), dtype=jnp.float32)
    w3 = 0.05 * jax.random.normal(k3, (hidden_dim, output_dim), dtype=jnp.float32)
    b1 = jnp.zeros((1, hidden_dim), dtype=jnp.float32)
    b2 = jnp.zeros((1, hidden_dim), dtype=jnp.float32)
    b3 = jnp.zeros((1, output_dim), dtype=jnp.float32)
    return (w1, b1, w2, b2, w3, b3)


def _reference(x, params):
    w1, b1, w2, b2, w3, b3 = params
    x2d = x.reshape(x.shape[0], -1).astype(jnp.float32)
    h1 = jax.nn.sigmoid(x2d @ w1 + b1)
    h2 = jax.nn.sigmoid(h1 @ w2 + b2)
    return h2 @ w3 + b3


if __name__ == "__main__":
    # Small shapes: batch=2, a (4, 16) per-sample feature map -> input_dim=64,
    # hidden_dim=32, output_dim=10.
    batch, c, s = 2, 4, 16
    input_dim = c * s          # 64 after flatten
    hidden_dim = 32
    output_dim = 10

    key = jax.random.PRNGKey(0)
    kx, kp = jax.random.split(key)
    x = jax.random.normal(kx, (batch, c, s), dtype=jnp.float32)
    params = init_params(kp, input_dim, hidden_dim, output_dim)

    out = fine_tuning_mlp_forward(x, params)
    out = jax.block_until_ready(out)

    ref = _reference(x, params)
    assert out.shape == (batch, output_dim)
    # bf16 MXU operands with f32 accumulation (+ approx EUP reciprocal in the sigmoid)
    # -> compare with a bf16-appropriate tolerance.
    assert jnp.allclose(out, ref, atol=2e-2, rtol=2e-2), float(jnp.max(jnp.abs(out - ref)))

    print("KERNEL_OK")
</pallas_src>

<mosaic_0001>
module attributes {stable_mosaic.version = 11 : i64} {
  func.func @_mlp_kernel(%arg0: i32, %arg1: memref<8x128xbf16, #tpu.memory_space<vmem>>, %arg2: memref<128x128xbf16, #tpu.memory_space<vmem>>, %arg3: memref<1x128xf32, #tpu.memory_space<vmem>>, %arg4: memref<128x128xbf16, #tpu.memory_space<vmem>>, %arg5: memref<1x128xf32, #tpu.memory_space<vmem>>, %arg6: memref<128x128xbf16, #tpu.memory_space<vmem>>, %arg7: memref<1x128xf32, #tpu.memory_space<vmem>>, %arg8: memref<8x128xf32, #tpu.memory_space<vmem>>) attributes {dimension_semantics = [#tpu.dimension_semantics<parallel>], iteration_bounds = array<i64: 1>, scalar_prefetch = 0 : i64, scratch_operands = 0 : i64, tpu.core_type = #tpu.core_type<tc>, window_params = [{transform_indices = @transform_0, window_bounds = array<i64: 8, 128>}, {pipeline_mode = #tpu.pipeline_mode<synchronous>, transform_indices = @transform_1, window_bounds = array<i64: 128, 128>}, {pipeline_mode = #tpu.pipeline_mode<synchronous>, transform_indices = @transform_2, window_bounds = array<i64: 1, 128>}, {pipeline_mode = #tpu.pipeline_mode<synchronous>, transform_indices = @transform_3, window_bounds = array<i64: 128, 128>}, {pipeline_mode = #tpu.pipeline_mode<synchronous>, transform_indices = @transform_4, window_bounds = array<i64: 1, 128>}, {pipeline_mode = #tpu.pipeline_mode<synchronous>, transform_indices = @transform_5, window_bounds = array<i64: 128, 128>}, {pipeline_mode = #tpu.pipeline_mode<synchronous>, transform_indices = @transform_6, window_bounds = array<i64: 1, 128>}, {transform_indices = @transform_7, window_bounds = array<i64: 8, 128>}]} {
    %c0 = arith.constant 0 : index
    %c0_0 = arith.constant 0 : index
    %0 = vector.load %arg1[%c0, %c0_0] : memref<8x128xbf16, #tpu.memory_space<vmem>>, vector<8x128xbf16>
    %c0_1 = arith.constant 0 : index
    %c0_2 = arith.constant 0 : index
    %1 = vector.load %arg2[%c0_1, %c0_2] : memref<128x128xbf16, #tpu.memory_space<vmem>>, vector<128x128xbf16>
    %cst = arith.constant dense<0.000000e+00> : vector<8x128xf32>
    %2 = tpu.matmul %0, %1, %cst {dimension_numbers = #tpu.dot_dimension_numbers<[1], [0], [0], [1], [0, 0, 1, 1], [], []>} : vector<8x128xbf16>, vector<128x128xbf16>, vector<8x128xf32> -> vector<8x128xf32>
    %c0_3 = arith.constant 0 : index
    %c0_4 = arith.constant 0 : index
    %3 = vector.load %arg3[%c0_3, %c0_4] : memref<1x128xf32, #tpu.memory_space<vmem>>, vector<1x128xf32>
    %4 = vector.broadcast %3 : vector<1x128xf32> to vector<8x128xf32>
    %5 = arith.addf %2, %4 : vector<8x128xf32>
    %cst_5 = arith.constant 0.000000e+00 : f32
    %6 = vector.broadcast %cst_5 : f32 to vector<8x128xf32>
    %7 = arith.subf %6, %5 : vector<8x128xf32>
    %8 = math.exp %7 : vector<8x128xf32>
    %cst_6 = arith.constant 1.000000e+00 : f32
    %9 = vector.broadcast %cst_6 : f32 to vector<8x128xf32>
    %10 = arith.addf %9, %8 : vector<8x128xf32>
    %11 = tpu.reciprocal %10 {approx = true} : vector<8x128xf32> -> vector<8x128xf32>
    %12 = arith.truncf %11 : vector<8x128xf32> to vector<8x128xbf16>
    %c0_7 = arith.constant 0 : index
    %c0_8 = arith.constant 0 : index
    %13 = vector.load %arg4[%c0_7, %c0_8] : memref<128x128xbf16, #tpu.memory_space<vmem>>, vector<128x128xbf16>
    %cst_9 = arith.constant dense<0.000000e+00> : vector<8x128xf32>
    %14 = tpu.matmul %12, %13, %cst_9 {dimension_numbers = #tpu.dot_dimension_numbers<[1], [0], [0], [1], [0, 0, 1, 1], [], []>} : vector<8x128xbf16>, vector<128x128xbf16>, vector<8x128xf32> -> vector<8x128xf32>
    %c0_10 = arith.constant 0 : index
    %c0_11 = arith.constant 0 : index
    %15 = vector.load %arg5[%c0_10, %c0_11] : memref<1x128xf32, #tpu.memory_space<vmem>>, vector<1x128xf32>
    %16 = vector.broadcast %15 : vector<1x128xf32> to vector<8x128xf32>
    %17 = arith.addf %14, %16 : vector<8x128xf32>
    %cst_12 = arith.constant 0.000000e+00 : f32
    %18 = vector.broadcast %cst_12 : f32 to vector<8x128xf32>
    %19 = arith.subf %18, %17 : vector<8x128xf32>
    %20 = math.exp %19 : vector<8x128xf32>
    %cst_13 = arith.constant 1.000000e+00 : f32
    %21 = vector.broadcast %cst_13 : f32 to vector<8x128xf32>
    %22 = arith.addf %21, %20 : vector<8x128xf32>
    %23 = tpu.reciprocal %22 {approx = true} : vector<8x128xf32> -> vector<8x128xf32>
    %24 = arith.truncf %23 : vector<8x128xf32> to vector<8x128xbf16>
    %c0_14 = arith.constant 0 : index
    %c0_15 = arith.constant 0 : index
    %25 = vector.load %arg6[%c0_14, %c0_15] : memref<128x128xbf16, #tpu.memory_space<vmem>>, vector<128x128xbf16>
    %cst_16 = arith.constant dense<0.000000e+00> : vector<8x128xf32>
    %26 = tpu.matmul %24, %25, %cst_16 {dimension_numbers = #tpu.dot_dimension_numbers<[1], [0], [0], [1], [0, 0, 1, 1], [], []>} : vector<8x128xbf16>, vector<128x128xbf16>, vector<8x128xf32> -> vector<8x128xf32>
    %c0_17 = arith.constant 0 : index
    %c0_18 = arith.constant 0 : index
    %27 = vector.load %arg7[%c0_17, %c0_18] : memref<1x128xf32, #tpu.memory_space<vmem>>, vector<1x128xf32>
    %28 = vector.broadcast %27 : vector<1x128xf32> to vector<8x128xf32>
    %29 = arith.addf %26, %28 : vector<8x128xf32>
    %c0_19 = arith.constant 0 : index
    %c0_20 = arith.constant 0 : index
    %30 = vector.load %arg8[%c0_19, %c0_20] : memref<8x128xf32, #tpu.memory_space<vmem>>, vector<8x128xf32>
    tpu.vector_store %arg8[%c0_19, %c0_20], %29 {strides = array<i32>} : memref<8x128xf32, #tpu.memory_space<vmem>>, vector<8x128xf32>,
    return
  }
  func.func @transform_0(%arg0: i32) -> (i32, i32) {
    %c0_i32 = arith.constant 0 : i32
    %c0_i32_0 = arith.constant 0 : i32
    return %arg0, %c0_i32 : i32, i32
  }
  func.func @transform_1(%arg0: i32) -> (i32, i32) {
    %c0_i32 = arith.constant 0 : i32
    %c0_i32_0 = arith.constant 0 : i32
    %c0_i32_1 = arith.constant 0 : i32
    return %c0_i32, %c0_i32_0 : i32, i32
  }
  func.func @transform_2(%arg0: i32) -> (i32, i32) {
    %c0_i32 = arith.constant 0 : i32
    %c0_i32_0 = arith.constant 0 : i32
    %c0_i32_1 = arith.constant 0 : i32
    return %c0_i32, %c0_i32_0 : i32, i32
  }
  func.func @transform_3(%arg0: i32) -> (i32, i32) {
    %c0_i32 = arith.constant 0 : i32
    %c0_i32_0 = arith.constant 0 : i32
    %c0_i32_1 = arith.constant 0 : i32
    return %c0_i32, %c0_i32_0 : i32, i32
  }
  func.func @transform_4(%arg0: i32) -> (i32, i32) {
    %c0_i32 = arith.constant 0 : i32
    %c0_i32_0 = arith.constant 0 : i32
    %c0_i32_1 = arith.constant 0 : i32
    return %c0_i32, %c0_i32_0 : i32, i32
  }
  func.func @transform_5(%arg0: i32) -> (i32, i32) {
    %c0_i32 = arith.constant 0 : i32
    %c0_i32_0 = arith.constant 0 : i32
    %c0_i32_1 = arith.constant 0 : i32
    return %c0_i32, %c0_i32_0 : i32, i32
  }
  func.func @transform_6(%arg0: i32) -> (i32, i32) {
    %c0_i32 = arith.constant 0 : i32
    %c0_i32_0 = arith.constant 0 : i32
    %c0_i32_1 = arith.constant 0 : i32
    return %c0_i32, %c0_i32_0 : i32, i32
  }
  func.func @transform_7(%arg0: i32) -> (i32, i32) {
    %c0_i32 = arith.constant 0 : i32
    %c0_i32_0 = arith.constant 0 : i32
    return %arg0, %c0_i32 : i32, i32
  }
}

</mosaic_0001>

<bundles_post_ra>
// kernel: tpu_custom_call.1
= control target key start
LH: loop header
LB: loop body
LE: loop exit
PB: predicated region body
PF: predicated region fallthrough
CT: control target
= control target key end

     0   :  { %12 = vsyncpa [#allocation3], 0  ;;  %s820_s0 = inlined_call_operand.hbm [shape: bf16[8,128], index: 0, kind: input, shape index: {}]   ;;  %s821_s1 = inlined_call_operand.hbm [shape: bf16[128,128], index: 1, kind: input, shape index: {}]   ;;  %s822_s2 = inlined_call_operand.vmem [shape: f32[1,128], index: 2, kind: input, shape index: {}]   ;;  %s823_s3 = inlined_call_operand.hbm [shape: bf16[128,128], index: 3, kind: input, shape index: {}]   ;;  %s824_s4 = inlined_call_operand.vmem [shape: f32[1,128], index: 4, kind: input, shape index: {}]   ;;  %s825_s5 = inlined_call_operand.hbm [shape: bf16[128,128], index: 5, kind: input, shape index: {}]   ;;  %s826_s6 = inlined_call_operand.vmem [shape: f32[1,128], index: 6, kind: input, shape index: {}]   ;;  %s827_s7 = inlined_call_operand.hbm [shape: f32[8,128], index: 7, kind: output, shape index: {}]  }
   0x1   :  { %13 = vsyncpa [#allocation6], 0 }
   0x2   :  { %14 = vsyncpa [#allocation9], 0 }
   0x3   :  { %15 = vsyncpa [#allocation4], 0  ;;  %s708_s24 = smov [#allocation5]  }
   0x4   :  { %s31_s25 = sshll.u32 %s708_s24, 4  ;;  %s32_s25 = int_to_ptr.vmem [resolvable:$true] %s31_s25 }
   0x5   :  { %s608_s26 = scalar_lea.vmem %s32_s25, 1024  ;;  %p613_p1 = scmp.lt.s32.totalorder %s32_s25, %s32_s25 }
   0x6   :  { %p609_p0 = scmp.ne.s32.totalorder %s32_s25, %s608_s26  ;;  %p614_p2 = scmp.lt.s32.totalorder %s608_s26, %s608_s26 }
   0x8   :  { %p615_p3 = por %p614_p2, %p613_p1 }
   0xa   :  { %p616_p4 = pnand %p615_p3, %p609_p0 }
   0xc   :  { %619 = shalt.err (!%p616_p4)
}
   0xd   :  { %s709_s27 = smov 64   ;;  %s710_s28 = smov 4  }
   0xe   :  { %37 = dma.hbm_to_vmem [thread:$0]  %s821_s1, 1024, %s32_s25, [#allocation6], %s709_s27, %s709_s27, %s710_s28  }
   0xf   :  { %s711_s8 = smov [#allocation2]   ;;  %s712_s10 = smov [#allocation7]  }
  0x10   :  { %s22_s9 = sshll.u32 %s711_s8, 4  ;;  %s45_s11 = sshll.u32 %s712_s10, 4  ;;  %s23_s9 = int_to_ptr.vmem [resolvable:$true] %s22_s9  ;;  %s46_s11 = int_to_ptr.vmem [resolvable:$true] %s45_s11 }
  0x11   :  { %s628_s12 = scalar_lea.vmem %s23_s9, 64  ;;  %p633_p6 = scmp.lt.s32.totalorder %s23_s9, %s23_s9 }
  0x12   :  { %p629_p5 = scmp.ne.s32.totalorder %s23_s9, %s628_s12  ;;  %p634_p7 = scmp.lt.s32.totalorder %s628_s12, %s628_s12 }
  0x14   :  { %p635_p8 = por %p634_p7, %p633_p6 }
  0x16   :  { %p636_p9 = pnand %p635_p8, %p629_p5 }
  0x18   :  { %639 = shalt.err (!%p636_p9)
}
  0x19   :  { %25 = dma.hbm_to_vmem [thread:$0]  %s820_s0, 64, %s23_s9, [#allocation3]  }
  0x1a   :  { %s648_s15 = scalar_lea.vmem %s46_s11, 1024  ;;  %p653_p11 = scmp.lt.s32.totalorder %s46_s11, %s46_s11 }
  0x1b   :  { %p649_p10 = scmp.ne.s32.totalorder %s46_s11, %s648_s15  ;;  %p654_p12 = scmp.lt.s32.totalorder %s648_s15, %s648_s15 }
  0x1d   :  { %p655_p13 = por %p654_p12, %p653_p11 }
  0x1f   :  { %p656_p0 = pnand %p655_p13, %p649_p10 }
  0x21   :  { %659 = shalt.err (!%p656_p0)
}
  0x22   :  { %51 = dma.hbm_to_vmem [thread:$0]  %s823_s3, 1024, %s46_s11, [#allocation6], %s709_s27, %s709_s27, %s710_s28  }
  0x23   :  { %s713_s17 = smov [#allocation8]  }
  0x24   :  { %s59_s18 = sshll.u32 %s713_s17, 4  ;;  %s60_s18 = int_to_ptr.vmem [resolvable:$true] %s59_s18 }
  0x25   :  { %s668_s19 = scalar_lea.vmem %s60_s18, 1024  ;;  %p673_p2 = scmp.lt.s32.totalorder %s60_s18, %s60_s18 }
  0x26   :  { %p669_p1 = scmp.ne.s32.totalorder %s60_s18, %s668_s19  ;;  %p674_p3 = scmp.lt.s32.totalorder %s668_s19, %s668_s19 }
  0x28   :  { %p675_p4 = por %p674_p3, %p673_p2 }
  0x2a   :  { %p676_p5 = pnand %p675_p4, %p669_p1 }
  0x2c   :  { %679 = shalt.err (!%p676_p5)
}
  0x2d   :  { %65 = dma.hbm_to_vmem [thread:$0]  %s825_s5, 1024, %s60_s18, [#allocation9], %s709_s27, %s709_s27, %s710_s28  }
  0x2e   :  { %700 = dma.done.wait [#allocation3], 64  }
  0x2f   :  { %701 = vsyncadd [#allocation3], 4294967232 }
  0x30   :  { %702 = dma.done.wait [#allocation6], 2048  }
  0x31   :  { %703 = vsyncadd [#allocation6], 4294965248 }
  0x32   :  { %704 = dma.done.wait [#allocation9], 1024  }
  0x33   :  { %705 = vsyncadd [#allocation9], 4294966272  ;;  %v714_v0 = vmov 0.0   ;;  %vm715_vm0 = vmmov 0   ;;  %v568_v1 = vld [vmem:[#allocation5 + $0x38] sm:$0xff]   ;;  %v569_v2 = vld [vmem:[#allocation5 + $0x30] sm:$0xff]  }
  0x34   :  { %499 = vmatprep.subr.bf16.mxu0 %v714_v0  ;;  %515 = vmatprep.mubr.msk.bf16.mxu0 %vm715_vm0, %v714_v0  ;;  %v570_v3 = vld [vmem:[#allocation5 + $0x28] sm:$0xff]   ;;  %v571_v4 = vld [vmem:[#allocation5 + $0x20] sm:$0xff]   ;;  %v572_v5 = vld [vmem:[#allocation5 + $0x18] sm:$0xff]   ;;  %s716_s24 = smov [#allocation10]  }
  0x35   :  { %519 = vmatprep.subr.bf16.mxu1 %v714_v0  ;;  %535 = vmatprep.mubr.msk.bf16.mxu1 %vm715_vm0, %v714_v0  ;;  %v573_v6 = vld [vmem:[#allocation5 + $0x10] sm:$0xff]   ;;  %v574_v7 = vld [vmem:[#allocation5 + $0x8] sm:$0xff]   ;;  %v575_v8 = vld [vmem:[#allocation5] sm:$0xff]  }
  0x36   :  { %500 = vmatpush3.bf16.msra.mxu0 %v568_v1  ;;  %v81_v9 = vld [vmem:[#allocation2] sm:$0xf]  ;;  %v577_v11 = vld [vmem:[#allocation7 + $0x30] sm:$0xff]   ;;  %v578_v12 = vld [vmem:[#allocation7 + $0x28] sm:$0xff]  }
  0x37   :  { %501 = vmatprep.subr.bf16.mxu0 %v714_v0  ;;  %v576_v10 = vld [vmem:[#allocation7 + $0x38] sm:$0xff]   ;;  %v579_v13 = vld [vmem:[#allocation7 + $0x20] sm:$0xff]   ;;  %v581_v15 = vld [vmem:[#allocation7 + $0x10] sm:$0xff]  }
  0x38   :  { %520 = vmatpush3.bf16.msra.mxu1 %v576_v10  ;;  %v580_v14 = vld [vmem:[#allocation7 + $0x18] sm:$0xff]   ;;  %v582_v16 = vld [vmem:[#allocation7 + $0x8] sm:$0xff]   ;;  %v583_v17 = vld [vmem:[#allocation7] sm:$0xff]  }
  0x39   :  { %521 = vmatprep.subr.bf16.mxu1 %v714_v0  ;;  %v445_v18 = vld [vmem:[%s822_s2] ss:$0 sm:$0xff]  ;;  %v585_v31 = vld [vmem:[#allocation8 + $0x30] sm:$0xff]   ;;  %v586_v32 = vld [vmem:[#allocation8 + $0x28] sm:$0xff]  }
  0x3a   :  { %502 = vmatpush3.bf16.msra.mxu0 %v569_v2  ;;  %v584_v30 = vld [vmem:[#allocation8 + $0x38] sm:$0xff]   ;;  %v587_v33 = vld [vmem:[#allocation8 + $0x20] sm:$0xff]   ;;  %v589_v35 = vld [vmem:[#allocation8 + $0x10] sm:$0xff]  }
  0x3b   :  { %503 = vmatprep.subr.bf16.mxu0 %v714_v0  ;;  %v588_v34 = vld [vmem:[#allocation8 + $0x18] sm:$0xff]   ;;  %v590_v36 = vld [vmem:[#allocation8 + $0x8] sm:$0xff]   ;;  %v591_v37 = vld [vmem:[#allocation8] sm:$0xff]  }
  0x3c   :  { %522 = vmatpush3.bf16.msra.mxu1 %v577_v11  ;;  %v454_v38 = vld [vmem:[%s824_s4] ss:$0 sm:$0xff]  ;;  %s434_s4 = sshll.u32 %s716_s24, 4  ;;  %s435_s4 = int_to_ptr.vmem [resolvable:$true] %s434_s4 }
  0x3d   :  { %523 = vmatprep.subr.bf16.mxu1 %v714_v0  ;;  %v463_v50 = vld [vmem:[%s826_s6] ss:$0 sm:$0xff]  ;;  %s680_s25 = scalar_lea.vmem %s435_s4, 128  ;;  %p685_p7 = scmp.lt.s32.totalorder %s435_s4, %s435_s4 }
  0x3e   :  { %504 = vmatpush3.bf16.msra.mxu0 %v570_v3  ;;  %p681_p6 = scmp.ne.s32.totalorder %s435_s4, %s680_s25  ;;  %p686_p8 = scmp.lt.s32.totalorder %s680_s25, %s680_s25 }
  0x3f   :  { %505 = vmatprep.subr.bf16.mxu0 %v714_v0 }
  0x40   :  { %524 = vmatpush3.bf16.msra.mxu1 %v578_v12  ;;  %p687_p9 = por %p686_p8, %p685_p7 }
  0x41   :  { %525 = vmatprep.subr.bf16.mxu1 %v714_v0 }
  0x42   :  { %506 = vmatpush3.bf16.msra.mxu0 %v571_v4  ;;  %p688_p10 = pnand %p687_p9, %p681_p6 }
  0x43   :  { %507 = vmatprep.subr.bf16.mxu0 %v714_v0 }
  0x44   :  { %526 = vmatpush3.bf16.msra.mxu1 %v579_v13 }
  0x45   :  { %527 = vmatprep.subr.bf16.mxu1 %v714_v0 }
  0x46   :  { %508 = vmatpush3.bf16.msra.mxu0 %v572_v5 }
  0x47   :  { %509 = vmatprep.subr.bf16.mxu0 %v714_v0 }
  0x48   :  { %528 = vmatpush3.bf16.msra.mxu1 %v580_v14 }
  0x49   :  { %529 = vmatprep.subr.bf16.mxu1 %v714_v0 }
  0x4a   :  { %510 = vmatpush3.bf16.msra.mxu0 %v573_v6 }
  0x4b   :  { %511 = vmatprep.subr.bf16.mxu0 %v714_v0 }
  0x4c   :  { %530 = vmatpush3.bf16.msra.mxu1 %v581_v15 }
  0x4d   :  { %531 = vmatprep.subr.bf16.mxu1 %v714_v0 }
  0x4e   :  { %512 = vmatpush3.bf16.msra.mxu0 %v574_v7 }
  0x4f   :  { %513 = vmatprep.subr.bf16.mxu0 %v714_v0 }
  0x50   :  { %532 = vmatpush3.bf16.msra.mxu1 %v582_v16 }
  0x51   :  { %533 = vmatprep.subr.bf16.mxu1 %v714_v0 }
  0x52   :  { %514 = vmatpush3.bf16.msra.mxu0 %v575_v8 }
  0x53   :  { %539 = vmatprep.subr.bf16.mxu0 %v714_v0 }
  0x54   :  { %534 = vmatpush3.bf16.msra.mxu1 %v583_v17 }
  0x55   :  { %516 = vmatmul.mubr.bf16.vlgmr.msra.gmra.mxu0 %v81_v9 }
  0x56   :  { %555 = vmatprep.mubr.msk.bf16.mxu0 %vm715_vm0, %v714_v0  ;;  %540 = vmatpush3.bf16.msra.mxu0 %v584_v30 }
  0x57   :  { %541 = vmatprep.subr.bf16.mxu0 %v714_v0 }
  0x5a   :  { %542 = vmatpush3.bf16.msra.mxu0 %v585_v31 }
  0x5b   :  { %543 = vmatprep.subr.bf16.mxu0 %v714_v0 }
  0x5e   :  { %544 = vmatpush3.bf16.msra.mxu0 %v586_v32 }
  0x5f   :  { %545 = vmatprep.subr.bf16.mxu0 %v714_v0 }
  0x62   :  { %546 = vmatpush3.bf16.msra.mxu0 %v587_v33 }
  0x63   :  { %547 = vmatprep.subr.bf16.mxu0 %v714_v0 }
  0x66   :  { %548 = vmatpush3.bf16.msra.mxu0 %v588_v34 }
  0x67   :  { %549 = vmatprep.subr.bf16.mxu0 %v714_v0 }
  0x6a   :  { %550 = vmatpush3.bf16.msra.mxu0 %v589_v35 }
  0x6b   :  { %551 = vmatprep.subr.bf16.mxu0 %v714_v0 }
  0x6e   :  { %552 = vmatpush3.bf16.msra.mxu0 %v590_v36 }
  0x6f   :  { %553 = vmatprep.subr.bf16.mxu0 %v714_v0 }
  0x72   :  { %554 = vmatpush3.bf16.msra.mxu0 %v591_v37 }
 0x115   :  { %v187_v19 = vpop.f32.mrf.mxu0 }
 0x116   :  { %v188_v20 = vadd.f32 %v445_v18, %v187_v19 }
 0x117   :  { %v517_v21 = vpop.f32.mrf.mxu0 }
 0x118   :  { %v193_v22 = vsub.f32 0.0, %v188_v20 }
 0x119   :  { %v190_v23 = vpop.f32.mrf.mxu0 }
 0x11a   :  { %v194_v24 = vmul.f32 1.442695, %v193_v22 }
 0x11b   :  { %v518_v25 = vpop.f32.mrf.mxu0 }
 0x11c   :  { %592 = vpow2.f32 %v194_v24 }
 0x129   :  { %v593_v26 = vpop.eup %592 }
 0x12a   :  { %v196_v27 = vadd.f32 1.0, %v593_v26 }
 0x12c   :  { %594 = vrcp.f32 %v196_v27 }
 0x139   :  { %v595_v28 = vpop.eup %594 }
 0x13a   :  { %v198_v29 = vpack.c.bf16 %v595_v28, %v595_v28 }
 0x13c   :  { %536 = vmatmul.mubr.bf16.vlgmr.msra.gmra.mxu1 %v198_v29 }
 0x1fc   :  { %v304_v39 = vpop.f32.mrf.mxu1 }
 0x1fd   :  { %v305_v40 = vadd.f32 %v454_v38, %v304_v39 }
 0x1fe   :  { %v537_v41 = vpop.f32.mrf.mxu1 }
 0x1ff   :  { %v310_v42 = vsub.f32 0.0, %v305_v40 }
 0x200   :  { %v307_v43 = vpop.f32.mrf.mxu1 }
 0x201   :  { %v311_v44 = vmul.f32 1.442695, %v310_v42 }
 0x202   :  { %v538_v45 = vpop.f32.mrf.mxu1 }
 0x203   :  { %596 = vpow2.f32 %v311_v44 }
 0x210   :  { %v597_v46 = vpop.eup %596 }
 0x211   :  { %v313_v47 = vadd.f32 1.0, %v597_v46 }
 0x213   :  { %598 = vrcp.f32 %v313_v47 }
 0x220   :  { %v599_v48 = vpop.eup %598 }
 0x221   :  { %v315_v49 = vpack.c.bf16 %v599_v48, %v599_v48 }
 0x223   :  { %556 = vmatmul.mubr.bf16.vlgmr.msra.gmra.mxu0 %v315_v49 }
 0x2e3   :  { %v421_v51 = vpop.f32.mrf.mxu0 }
 0x2e4   :  { %v422_v52 = vadd.f32 %v463_v50, %v421_v51 }
 0x2e5   :  { %v557_v53 = vpop.f32.mrf.mxu0 }
 0x2e6   :  { %427 = vst [vmem:[#allocation10] sm:$0xff] %v422_v52 }
 0x2e7   :  { %v424_v54 = vpop.f32.mrf.mxu0 }
 0x2e8   :  { %691 = shalt.err (!%p688_p10)
}
 0x2e9   :  { %437 = dma.vmem_to_hbm [thread:$0]  %s435_s4, 128, %s827_s7, [#allocation4]   ;;  %v558_v55 = vpop.f32.mrf.mxu0 }
 0x2ea   :  { %706 = dma.done.wait [#allocation4], 128  }
 0x2eb   :  { %707 = vsyncadd [#allocation4], 4294967168 }
 0x2ec   :  { %441 = vsyncpa [#allocation3], 1 }
 0x2ed   :  { %442 = vsyncpa [#allocation6], 1 }
 0x2ee   :  { %443 = vsyncpa [#allocation9], 1 }
 0x2ef   :  { %444 = vsyncpa [#allocation4], 1 }

</bundles_post_ra>
